<compile_context>
chip_gen: v5e
topology: v5e:2x2
jax: 0.10.0
libtpu: 0.0.40
codegen_flags: <defaults>
</compile_context>

<pallas_src>
import jax
import jax.numpy as jnp
from jax.experimental import pallas as pl
from jax.experimental.pallas import tpu as pltpu

LANE = 128  # TPU lane width; the hidden dim is padded to this once, at init.


def _round_up(n, m):
    return ((n + m - 1) // m) * m


def dqn_mlp_kernel(x_ref, w1_ref, b1_ref, w2_ref, b2_ref, w3_ref, b3_ref, o_ref):
    # fc1 + relu: (TB, in) @ (in, 128) -> (TB, 128)
    h1 = jnp.dot(x_ref[...], w1_ref[...], preferred_element_type=jnp.float32)
    h1 = jnp.maximum(h1 + b1_ref[...], 0.0)
    # fc2 + relu: (TB, 128) @ (128, 128)
    h2 = jnp.dot(h1, w2_ref[...], preferred_element_type=jnp.float32)
    h2 = jnp.maximum(h2 + b2_ref[...], 0.0)
    # fc3 (no activation): (TB, 128) @ (128, out_size) -> narrow store (tiny)
    out = jnp.dot(h2, w3_ref[...], preferred_element_type=jnp.float32)
    o_ref[...] = (out + b3_ref[...]).astype(o_ref.dtype)


@jax.jit
def dqn_forward(x, padded_params):
    """x: (B, input_size) f32; padded_params from prepare_params()."""
    w1, b1, w2, b2, w3, b3 = padded_params
    B, in_size = x.shape
    hid_p = w1.shape[1]
    out_size = w3.shape[1]

    # Tile selection: minimize grid steps (per-step overhead ~0.35us dwarfs
    # the ~0.03us of per-tile compute). Tiny batches -> one tile; otherwise
    # two tiles so v7x's 2 TensorCores can both run the "parallel" axis.
    if B <= 8:
        TB = _round_up(max(B, 1), 8)
    else:
        TB = min(_round_up(-(-B // 2), 8), 1024)
    n_tiles = -(-B // TB)
    B_p = n_tiles * TB
    x_p = x if B_p == B else jnp.pad(x, ((0, B_p - B), (0, 0)))

    flops = 2 * B_p * (in_size * hid_p + hid_p * hid_p + hid_p * out_size)
    bytes_accessed = 4 * (
        B_p * in_size                                         # x
        + in_size * hid_p + hid_p * hid_p + hid_p * out_size  # weights
        + 2 * hid_p + out_size                                # biases
        + B_p * out_size                                      # out
    )
    cost = pl.CostEstimate(
        flops=flops, transcendentals=0, bytes_accessed=bytes_accessed
    )

    # Weights/biases: constant index_map -> resident in VMEM across all grid
    # steps (DMA'd from HBM once). x/out: tiled over batch rows.
    def resident(shape):
        return pl.BlockSpec(shape, lambda i: (0,) * len(shape))

    out = pl.pallas_call(
        dqn_mlp_kernel,
        out_shape=jax.ShapeDtypeStruct((B_p, out_size), jnp.float32),
        grid=(n_tiles,),
        in_specs=[
            pl.BlockSpec((TB, in_size), lambda i: (i, 0)),  # x: row-tiled, unpadded K
            resident((in_size, hid_p)),                     # w1
            resident((1, hid_p)),                           # b1
            resident((hid_p, hid_p)),                       # w2
            resident((1, hid_p)),                           # b2
            resident((hid_p, out_size)),                    # w3 (narrow N)
            resident((1, out_size)),                        # b3
        ],
        out_specs=pl.BlockSpec((TB, out_size), lambda i: (i, 0)),
        compiler_params=pltpu.CompilerParams(
            dimension_semantics=("parallel",),
        ),
        cost_estimate=cost,
    )(x_p, w1, b1, w2, b2, w3, b3)

    return out if B_p == B else out[:B]


def init_dqn_params(key, input_size, output_size, hidden=64):
    # Deterministic init mimicking nn.Linear's U(-1/sqrt(fan_in), 1/sqrt(fan_in)).
    ks = jax.random.split(key, 6)

    def linear(kw, kb, fan_in, fan_out):
        bound = 1.0 / jnp.sqrt(float(fan_in))
        w = jax.random.uniform(kw, (fan_in, fan_out), jnp.float32, -bound, bound)
        b = jax.random.uniform(kb, (1, fan_out), jnp.float32, -bound, bound)
        return w, b

    w1, b1 = linear(ks[0], ks[1], input_size, hidden)
    w2, b2 = linear(ks[2], ks[3], hidden, hidden)
    w3, b3 = linear(ks[4], ks[5], hidden, output_size)
    return (w1, b1, w2, b2, w3, b3)


def prepare_params(params):
    """One-time, out-of-the-hot-path padding of the hidden dim to 128 lanes.

    Zero-padding is exact: padded w1 columns / b1 entries are zero, so the
    padded h1 lanes are zero after ReLU; padded w2/w3 rows are zero as well,
    so the real outputs are unchanged.  Input and output feature dims are
    left unpadded (full-dim BlockSpecs handle them).
    """
    w1, b1, w2, b2, w3, b3 = params
    in_size, hidden = w1.shape
    out_size = w3.shape[1]
    hid_p = _round_up(hidden, LANE)
    ph = hid_p - hidden
    w1_p = jnp.pad(w1, ((0, 0), (0, ph)))
    b1_p = jnp.pad(b1, ((0, 0), (0, ph)))
    w2_p = jnp.pad(w2, ((0, ph), (0, ph)))
    b2_p = jnp.pad(b2, ((0, 0), (0, ph)))
    w3_p = jnp.pad(w3, ((0, ph), (0, 0)))
    b3_p = b3
    return (w1_p, b1_p, w2_p, b2_p, w3_p, b3_p)


def _reference(x, params):
    w1, b1, w2, b2, w3, b3 = params
    h = jnp.maximum(x @ w1 + b1, 0.0)
    h = jnp.maximum(h @ w2 + b2, 0.0)
    return h @ w3 + b3


if __name__ == "__main__":
    key = jax.random.PRNGKey(0)
    k_x, k_x2, k_p = jax.random.split(key, 3)

    input_size, output_size = 32, 4
    params = init_dqn_params(k_p, input_size, output_size)
    padded_params = jax.tree.map(
        jax.block_until_ready, prepare_params(params)
    )  # padded once, reused for every forward

    # Small batch (original DQN usage pattern): single grid step.
    batch = 8
    x_small = jax.random.normal(k_x, (batch, input_size), jnp.float32)
    out_small = jax.block_until_ready(dqn_forward(x_small, padded_params))
    ref_small = _reference(x_small, params)
    assert out_small.shape == (batch, output_size)
    assert jnp.allclose(out_small, ref_small, atol=1e-5, rtol=1e-5)

    # Larger batch: two 128-row tiles on the "parallel" axis (both v7x TCs),
    # weights resident in VMEM across steps, no row padding needed.
    big_batch = 256
    x_big = jax.random.normal(k_x2, (big_batch, input_size), jnp.float32)
    out_big = jax.block_until_ready(dqn_forward(x_big, padded_params))
    ref_big = _reference(x_big, params)
    assert out_big.shape == (big_batch, output_size)
    assert jnp.allclose(out_big, ref_big, atol=1e-5, rtol=1e-5)

    print("KERNEL_OK")
</pallas_src>

<mosaic_0001>
module attributes {stable_mosaic.version = 11 : i64} {
  func.func @dqn_mlp_kernel(%arg0: i32, %arg1: memref<8x32xf32, #tpu.memory_space<vmem>>, %arg2: memref<32x128xf32, #tpu.memory_space<vmem>>, %arg3: memref<1x128xf32, #tpu.memory_space<vmem>>, %arg4: memref<128x128xf32, #tpu.memory_space<vmem>>, %arg5: memref<1x128xf32, #tpu.memory_space<vmem>>, %arg6: memref<128x4xf32, #tpu.memory_space<vmem>>, %arg7: memref<1x4xf32, #tpu.memory_space<vmem>>, %arg8: memref<8x4xf32, #tpu.memory_space<vmem>>) attributes {dimension_semantics = [#tpu.dimension_semantics<parallel>], iteration_bounds = array<i64: 1>, scalar_prefetch = 0 : i64, scratch_operands = 0 : i64, tpu.core_type = #tpu.core_type<tc>, window_params = [{transform_indices = @transform_0, window_bounds = array<i64: 8, 32>}, {pipeline_mode = #tpu.pipeline_mode<synchronous>, transform_indices = @transform_1, window_bounds = array<i64: 32, 128>}, {pipeline_mode = #tpu.pipeline_mode<synchronous>, transform_indices = @transform_2, window_bounds = array<i64: 1, 128>}, {pipeline_mode = #tpu.pipeline_mode<synchronous>, transform_indices = @transform_3, window_bounds = array<i64: 128, 128>}, {pipeline_mode = #tpu.pipeline_mode<synchronous>, transform_indices = @transform_4, window_bounds = array<i64: 1, 128>}, {pipeline_mode = #tpu.pipeline_mode<synchronous>, transform_indices = @transform_5, window_bounds = array<i64: 128, 4>}, {pipeline_mode = #tpu.pipeline_mode<synchronous>, transform_indices = @transform_6, window_bounds = array<i64: 1, 4>}, {transform_indices = @transform_7, window_bounds = array<i64: 8, 4>}]} {
    %c0 = arith.constant 0 : index
    %c0_0 = arith.constant 0 : index
    %0 = vector.load %arg1[%c0, %c0_0] : memref<8x32xf32, #tpu.memory_space<vmem>>, vector<8x32xf32>
    %c0_1 = arith.constant 0 : index
    %c0_2 = arith.constant 0 : index
    %1 = vector.load %arg2[%c0_1, %c0_2] : memref<32x128xf32, #tpu.memory_space<vmem>>, vector<32x128xf32>
    %cst = arith.constant dense<0.000000e+00> : vector<8x128xf32>
    %2 = tpu.matmul %0, %1, %cst {dimension_numbers = #tpu.dot_dimension_numbers<[1], [0], [0], [1], [0, 0, 1, 1], [], []>} : vector<8x32xf32>, vector<32x128xf32>, vector<8x128xf32> -> vector<8x128xf32>
    %c0_3 = arith.constant 0 : index
    %c0_4 = arith.constant 0 : index
    %3 = vector.load %arg3[%c0_3, %c0_4] : memref<1x128xf32, #tpu.memory_space<vmem>>, vector<1x128xf32>
    %4 = vector.broadcast %3 : vector<1x128xf32> to vector<8x128xf32>
    %5 = arith.addf %2, %4 : vector<8x128xf32>
    %cst_5 = arith.constant 0.000000e+00 : f32
    %6 = vector.broadcast %cst_5 : f32 to vector<8x128xf32>
    %7 = arith.maximumf %5, %6 : vector<8x128xf32>
    %c0_6 = arith.constant 0 : index
    %c0_7 = arith.constant 0 : index
    %8 = vector.load %arg4[%c0_6, %c0_7] : memref<128x128xf32, #tpu.memory_space<vmem>>, vector<128x128xf32>
    %cst_8 = arith.constant dense<0.000000e+00> : vector<8x128xf32>
    %9 = tpu.matmul %7, %8, %cst_8 {dimension_numbers = #tpu.dot_dimension_numbers<[1], [0], [0], [1], [0, 0, 1, 1], [], []>} : vector<8x128xf32>, vector<128x128xf32>, vector<8x128xf32> -> vector<8x128xf32>
    %c0_9 = arith.constant 0 : index
    %c0_10 = arith.constant 0 : index
    %10 = vector.load %arg5[%c0_9, %c0_10] : memref<1x128xf32, #tpu.memory_space<vmem>>, vector<1x128xf32>
    %11 = vector.broadcast %10 : vector<1x128xf32> to vector<8x128xf32>
    %12 = arith.addf %9, %11 : vector<8x128xf32>
    %cst_11 = arith.constant 0.000000e+00 : f32
    %13 = vector.broadcast %cst_11 : f32 to vector<8x128xf32>
    %14 = arith.maximumf %12, %13 : vector<8x128xf32>
    %c0_12 = arith.constant 0 : index
    %c0_13 = arith.constant 0 : index
    %15 = vector.load %arg6[%c0_12, %c0_13] : memref<128x4xf32, #tpu.memory_space<vmem>>, vector<128x4xf32>
    %cst_14 = arith.constant dense<0.000000e+00> : vector<8x4xf32>
    %16 = tpu.matmul %14, %15, %cst_14 {dimension_numbers = #tpu.dot_dimension_numbers<[1], [0], [0], [1], [0, 0, 1, 1], [], []>} : vector<8x128xf32>, vector<128x4xf32>, vector<8x4xf32> -> vector<8x4xf32>
    %c0_15 = arith.constant 0 : index
    %c0_16 = arith.constant 0 : index
    %17 = vector.load %arg7[%c0_15, %c0_16] : memref<1x4xf32, #tpu.memory_space<vmem>>, vector<1x4xf32>
    %18 = vector.broadcast %17 : vector<1x4xf32> to vector<8x4xf32>
    %19 = arith.addf %16, %18 : vector<8x4xf32>
    %c0_17 = arith.constant 0 : index
    %c0_18 = arith.constant 0 : index
    %20 = vector.load %arg8[%c0_17, %c0_18] : memref<8x4xf32, #tpu.memory_space<vmem>>, vector<8x4xf32>
    tpu.vector_store %arg8[%c0_17, %c0_18], %19 {strides = array<i32>} : memref<8x4xf32, #tpu.memory_space<vmem>>, vector<8x4xf32>,
    return
  }
  func.func @transform_0(%arg0: i32) -> (i32, i32) {
    %c0_i32 = arith.constant 0 : i32
    %c0_i32_0 = arith.constant 0 : i32
    return %arg0, %c0_i32 : i32, i32
  }
  func.func @transform_1(%arg0: i32) -> (i32, i32) {
    %c0_i32 = arith.constant 0 : i32
    %c0_i32_0 = arith.constant 0 : i32
    %c0_i32_1 = arith.constant 0 : i32
    return %c0_i32, %c0_i32_0 : i32, i32
  }
  func.func @transform_2(%arg0: i32) -> (i32, i32) {
    %c0_i32 = arith.constant 0 : i32
    %c0_i32_0 = arith.constant 0 : i32
    %c0_i32_1 = arith.constant 0 : i32
    return %c0_i32, %c0_i32_0 : i32, i32
  }
  func.func @transform_3(%arg0: i32) -> (i32, i32) {
    %c0_i32 = arith.constant 0 : i32
    %c0_i32_0 = arith.constant 0 : i32
    %c0_i32_1 = arith.constant 0 : i32
    return %c0_i32, %c0_i32_0 : i32, i32
  }
  func.func @transform_4(%arg0: i32) -> (i32, i32) {
    %c0_i32 = arith.constant 0 : i32
    %c0_i32_0 = arith.constant 0 : i32
    %c0_i32_1 = arith.constant 0 : i32
    return %c0_i32, %c0_i32_0 : i32, i32
  }
  func.func @transform_5(%arg0: i32) -> (i32, i32) {
    %c0_i32 = arith.constant 0 : i32
    %c0_i32_0 = arith.constant 0 : i32
    %c0_i32_1 = arith.constant 0 : i32
    return %c0_i32, %c0_i32_0 : i32, i32
  }
  func.func @transform_6(%arg0: i32) -> (i32, i32) {
    %c0_i32 = arith.constant 0 : i32
    %c0_i32_0 = arith.constant 0 : i32
    %c0_i32_1 = arith.constant 0 : i32
    return %c0_i32, %c0_i32_0 : i32, i32
  }
  func.func @transform_7(%arg0: i32) -> (i32, i32) {
    %c0_i32 = arith.constant 0 : i32
    %c0_i32_0 = arith.constant 0 : i32
    return %arg0, %c0_i32 : i32, i32
  }
}

</mosaic_0001>

<bundles_post_ra>
// kernel: dqn_forward.1
= control target key start
LH: loop header
LB: loop body
LE: loop exit
PB: predicated region body
PF: predicated region fallthrough
CT: control target
= control target key end

     0   :  { %12 = vsyncpa [#allocation3], 0  ;;  %s397_s0 = inlined_call_operand.hbm [shape: f32[8,32], index: 0, kind: input, shape index: {}]   ;;  %s398_s1 = inlined_call_operand.hbm [shape: f32[32,128], index: 1, kind: input, shape index: {}]   ;;  %s399_s2 = inlined_call_operand.vmem [shape: f32[1,128], index: 2, kind: input, shape index: {}]   ;;  %s400_s3 = inlined_call_operand.vmem [shape: f32[128,128], index: 3, kind: input, shape index: {}]   ;;  %s401_s4 = inlined_call_operand.vmem [shape: f32[1,128], index: 4, kind: input, shape index: {}]   ;;  %s402_s5 = inlined_call_operand.vmem [shape: f32[128,4], index: 5, kind: input, shape index: {}]   ;;  %s403_s6 = inlined_call_operand.vmem [shape: f32[1,4], index: 6, kind: input, shape index: {}]   ;;  %s404_s7 = inlined_call_operand.vmem [shape: f32[8,4], index: 7, kind: output, shape index: {}]  }
   0x1   :  { %s19_s26 = sshll.u32 %s397_s0, 4  ;;  %s20_s26 = int_to_ptr.hbm [resolvable:$true] %s19_s26 }
   0x2   :  { %13 = vsyncpa [#allocation5], 0  ;;  %s239_s27 = smov [#allocation2]   ;;  %s29_s8 = sshll.u32 %s398_s1, 4  ;;  %s30_s8 = int_to_ptr.hbm [resolvable:$true] %s29_s8 }
   0x3   :  { %s21_s28 = sshll.u32 %s239_s27, 4  ;;  %s240_s9 = smov [#allocation4]   ;;  %s22_s28 = int_to_ptr.vmem [resolvable:$true] %s21_s28 }
   0x4   :  { %24 = dma.hbm_to_vmem [thread:$0]  %s20_s26, 128, %s22_s28, [#allocation3]  }
   0x5   :  { %s31_s10 = sshll.u32 %s240_s9, 4  ;;  %s241_s11 = smov 128   ;;  %s32_s10 = int_to_ptr.vmem [resolvable:$true] %s31_s10 }
   0x6   :  { %s242_s12 = smov 8  }
   0x7   :  { %37 = dma.hbm_to_vmem [thread:$0]  %s30_s8, 512, %s32_s10, [#allocation5], %s241_s11, %s241_s11, %s242_s12  }
   0x8   :  { %235 = dma.done.wait [#allocation3], 128  }
   0x9   :  { %236 = vsyncadd [#allocation3], 4294967168 }
   0xa   :  { %237 = dma.done.wait [#allocation5], 512  }
   0xb   :  { %238 = vsyncadd [#allocation5], 4294966784  ;;  %v60_v0 = vld [vmem:[#allocation4 + $0x18] sm:$0xff]  ;;  %v59_v1 = vld [vmem:[#allocation4 + $0x10] sm:$0xff]  ;;  %vm65_vm0 = vcmask 261120   ;;  %vm171_vm1 = vcmask 31744  }
   0xc   :  { %81 = vmatpush.msra.mxu0 %v60_v0  ;;  %v105_v2 = vld [vmem:[%s400_s3 + $0x78] sm:$0xff]  ;;  %v58_v3 = vld [vmem:[#allocation4 + $0x8] sm:$0xff]  ;;  %v103_v5 = vld [vmem:[%s400_s3 + $0x68] sm:$0xff] }
   0xd   :  { %110 = vmatpush.msra.mxu1 %v105_v2  ;;  %v104_v4 = vld [vmem:[%s400_s3 + $0x70] sm:$0xff]  ;;  %v57_v6 = vld [vmem:[#allocation4] sm:$0xff]  ;;  %v56_v7 = vld [vmem:[#allocation2] sm:$0xff] }
   0xe   :  { %82 = vmatpush.msra.mxu0 %v59_v1  ;;  %v102_v8 = vld [vmem:[%s400_s3 + $0x60] sm:$0xff]  ;;  %v101_v9 = vld [vmem:[%s400_s3 + $0x58] sm:$0xff]  ;;  %v100_v10 = vld [vmem:[%s400_s3 + $0x50] sm:$0xff] }
   0xf   :  { %111 = vmatpush.msra.mxu1 %v104_v4  ;;  %v99_v11 = vld [vmem:[%s400_s3 + $0x48] sm:$0xff]  ;;  %v98_v12 = vld [vmem:[%s400_s3 + $0x40] sm:$0xff]  ;;  %v97_v13 = vld [vmem:[%s400_s3 + $0x38] sm:$0xff] }
  0x10   :  { %83 = vmatpush.msra.mxu0 %v58_v3  ;;  %v96_v14 = vld [vmem:[%s400_s3 + $0x30] sm:$0xff]  ;;  %v95_v15 = vld [vmem:[%s400_s3 + $0x28] sm:$0xff]  ;;  %v94_v16 = vld [vmem:[%s400_s3 + $0x20] sm:$0xff] }
  0x11   :  { %112 = vmatpush.msra.mxu1 %v103_v5  ;;  %v93_v17 = vld [vmem:[%s400_s3 + $0x18] sm:$0xff]  ;;  %v92_v18 = vld [vmem:[%s400_s3 + $0x10] sm:$0xff]  ;;  %v91_v19 = vld [vmem:[%s400_s3 + $0x8] sm:$0xff] }
  0x12   :  { %84 = vmatpush.msra.mxu0 %v57_v6  ;;  %v90_v20 = vld [vmem:[%s400_s3] sm:$0xff]  ;;  %v146_v21 = vld [vmem:[%s402_s5 + $0x78] sm:$0xff]  ;;  %v145_v22 = vld [vmem:[%s402_s5 + $0x70] sm:$0xff] }
  0x13   :  { %179 = vmatmul.msk.f32.vlgmr.msra.gmra.mxu0 %vm65_vm0, %v56_v7  ;;  %113 = vmatpush.msra.mxu1 %v102_v8  ;;  %v144_v23 = vld [vmem:[%s402_s5 + $0x68] sm:$0xff]  ;;  %v143_v24 = vld [vmem:[%s402_s5 + $0x60] sm:$0xff]  ;;  %v142_v25 = vld [vmem:[%s402_s5 + $0x58] sm:$0xff] }
  0x14   :  { %151 = vmatpush.msra.mxu2 %v146_v21  ;;  %v141_v26 = vld [vmem:[%s402_s5 + $0x50] sm:$0xff]  ;;  %v140_v27 = vld [vmem:[%s402_s5 + $0x48] sm:$0xff]  ;;  %v139_v28 = vld [vmem:[%s402_s5 + $0x40] sm:$0xff] }
  0x15   :  { %114 = vmatpush.msra.mxu1 %v101_v9  ;;  %v138_v29 = vld [vmem:[%s402_s5 + $0x38] sm:$0xff]  ;;  %v137_v30 = vld [vmem:[%s402_s5 + $0x30] sm:$0xff]  ;;  %v136_v31 = vld [vmem:[%s402_s5 + $0x28] sm:$0xff] }
  0x16   :  { %152 = vmatpush.msra.mxu2 %v145_v22  ;;  %v135_v32 = vld [vmem:[%s402_s5 + $0x20] sm:$0xff]  ;;  %v134_v33 = vld [vmem:[%s402_s5 + $0x18] sm:$0xff]  ;;  %v133_v38 = vld [vmem:[%s402_s5 + $0x10] sm:$0xff] }
  0x17   :  { %115 = vmatpush.msra.mxu1 %v100_v10  ;;  %v184_v34 = vld [vmem:[%s399_s2] ss:$0 sm:$0xff]  ;;  %v132_v39 = vld [vmem:[%s402_s5 + $0x8] sm:$0xff] }
  0x18   :  { %153 = vmatpush.msra.mxu2 %v144_v23  ;;  %v131_v40 = vld [vmem:[%s402_s5] sm:$0xff] }
  0x19   :  { %116 = vmatpush.msra.mxu1 %v99_v11  ;;  %v185_v41 = vld [vmem:[%s401_s4] ss:$0 sm:$0xff] }
  0x1a   :  { %154 = vmatpush.msra.mxu2 %v143_v24  ;;  %v186_v45 = vld [vmem:[%s403_s6] ss:$0 sm:$0xff] }
  0x1b   :  { %117 = vmatpush.msra.mxu1 %v98_v12 }
  0x1c   :  { %155 = vmatpush.msra.mxu2 %v142_v25 }
  0x1d   :  { %118 = vmatpush.msra.mxu1 %v97_v13 }
  0x1e   :  { %156 = vmatpush.msra.mxu2 %v141_v26 }
  0x1f   :  { %119 = vmatpush.msra.mxu1 %v96_v14 }
  0x20   :  { %157 = vmatpush.msra.mxu2 %v140_v27 }
  0x21   :  { %120 = vmatpush.msra.mxu1 %v95_v15 }
  0x22   :  { %158 = vmatpush.msra.mxu2 %v139_v28 }
  0x23   :  { %121 = vmatpush.msra.mxu1 %v94_v16 }
  0x24   :  { %159 = vmatpush.msra.mxu2 %v138_v29 }
  0x25   :  { %122 = vmatpush.msra.mxu1 %v93_v17 }
  0x26   :  { %160 = vmatpush.msra.mxu2 %v137_v30 }
  0x27   :  { %123 = vmatpush.msra.mxu1 %v92_v18 }
  0x28   :  { %161 = vmatpush.msra.mxu2 %v136_v31 }
  0x29   :  { %124 = vmatpush.msra.mxu1 %v91_v19 }
  0x2a   :  { %162 = vmatpush.msra.mxu2 %v135_v32 }
  0x2b   :  { %125 = vmatpush.msra.mxu1 %v90_v20 }
  0x2c   :  { %163 = vmatpush.msra.mxu2 %v134_v33 }
  0x2e   :  { %164 = vmatpush.msra.mxu2 %v133_v38 }
  0x30   :  { %165 = vmatpush.msra.mxu2 %v132_v39 }
  0x32   :  { %166 = vmatpush.msra.mxu2 %v131_v40 }
  0x90   :  { %v86_v35 = vpop.f32.mrf.mxu0 }
  0x91   :  { %v87_v36 = vadd.f32 %v184_v34, %v86_v35 }
  0x93   :  { %v89_v37 = vmax.f32 %v87_v36, 0.0 }
  0x95   :  { %126 = vmatmul.f32.vlgmr.msra.gmra.mxu1 %v89_v37 }
 0x112   :  { %v127_v42 = vpop.f32.mrf.mxu1 }
 0x113   :  { %v128_v43 = vadd.f32 %v185_v41, %v127_v42 }
 0x115   :  { %v130_v44 = vmax.f32 %v128_v43, 0.0 }
 0x117   :  { %167 = vmatmul.f32.vlgmr.msra.gmra.mxu2 %v130_v44 }
 0x19a   :  { %v168_v46 = vpop.f32.mrf.mxu2 }
 0x19b   :  { %v169_v47 = vadd.f32 %v186_v45, %v168_v46 }
 0x19d   :  { %172 = vst.msk [vmem:[%s404_s7] sm:$0xff] %vm171_vm1, %v169_v47 }
 0x19e   :  { %177 = vsyncpa [#allocation3], 1 }
 0x19f   :  { %178 = vsyncpa [#allocation5], 1 }

</bundles_post_ra>
